<compile_context>
chip_gen: v5e
topology: v5e:2x2
jax: 0.10.0
libtpu: 0.0.40
codegen_flags: <defaults>
</compile_context>

<pallas_src>
import functools
import math

import jax
import jax.numpy as jnp
from jax.experimental import pallas as pl
from jax.experimental.pallas import tpu as pltpu


def build_pe(d_model: int, max_len: int = 1000) -> jnp.ndarray:
    """Sinusoidal positional-encoding buffer, shape (max_len, 1, d_model), f32."""
    position = jnp.arange(0, max_len, dtype=jnp.float32)[:, None]            # (max_len, 1)
    div_term = jnp.exp(
        jnp.arange(0, d_model, 2, dtype=jnp.float32) * (-math.log(10000.0) / d_model)
    )
    pe = jnp.zeros((max_len, d_model), dtype=jnp.float32)
    pe = pe.at[:, 0::2].set(jnp.sin(position * div_term))
    # cos branch has floor(d/2) columns; slice div_term so odd d_model also works
    pe = pe.at[:, 1::2].set(jnp.cos(position * div_term[: d_model // 2]))
    # unsqueeze(0).transpose(0, 1) -> (max_len, 1, d_model)
    return pe[:, None, :]


def _round_up(v: int, m: int) -> int:
    return ((v + m - 1) // m) * m


def _vmem_capacity_bytes() -> int:
    try:
        return int(pltpu.get_tpu_info().vmem_capacity_bytes)
    except Exception:
        return 64 << 20  # conservative fallback: v7x per-TensorCore VMEM


def _choose_seq_tile(S: int, B: int, D: int, x_bytes: int, pe_bytes: int,
                     block_budget: int) -> int:
    """Sequence rows per grid step, sized by physically padded VMEM bytes."""
    sub = _round_up(max(B, 1), 8)        # (ts, B, D) block pads B up to 8 sublanes
    lane = _round_up(D, 128)             # ... and D up to a multiple of 128 lanes
    row_x = sub * lane * x_bytes         # physical bytes per seq row of an x/out block
    row_pe = 8 * lane * pe_bytes         # pe block row (sublane dim 1 -> padded to 8)
    per_row = 2 * (2 * row_x + row_pe)   # double-buffered x-in + out + pe-in

    ts = min(
        S,
        max(1, (8 << 20) // row_x),          # ~8 MiB x block: per-step overhead amortized
        max(1, block_budget // per_row),     # fit the generation-specific VMEM budget
    )
    n = pl.cdiv(S, ts)
    if n == 1 and S * row_x > (4 << 20):
        n = 2                                # large input: give v7x's 2nd TC work
    if n > 1 and n % 2:
        n += 1                               # even split across two TensorCores
    ts = pl.cdiv(S, n)
    # Keep the realized block count even after ceil rounding (bounded nudge).
    while n > 1 and ts > 1 and pl.cdiv(S, ts) % 2:
        ts -= 1
    return ts


def _pe_add_kernel(x_ref, pe_ref, o_ref):
    # x_ref: (ts, B, D); pe_ref: (ts, 1, D) -> broadcast add over the batch dim.
    o_ref[...] = (x_ref[...] + pe_ref[...]).astype(o_ref.dtype)


def positional_encoding_forward(x: jnp.ndarray, pe: jnp.ndarray, *,
                                seq_block: int | None = None) -> jnp.ndarray:
    """x: (S, B, D); pe: (max_len, 1, D). Returns x + pe[:S] in x.dtype."""
    S, B, D = x.shape
    assert pe.ndim == 3 and pe.shape[0] >= S and pe.shape[1] == 1 and pe.shape[2] == D

    if pe.dtype != x.dtype:
        # One small cast pass (pe is ~1/B of x's footprint); prefer pre-casting at init.
        pe = pe[:S].astype(x.dtype)

    vmem_cap = _vmem_capacity_bytes()
    vmem_limit = (vmem_cap * 3) // 4          # <=48 MiB on v7x, <=96 MiB on v5e/v6e
    block_budget = vmem_limit // 2            # headroom for bookkeeping / semaphores

    if seq_block is not None:
        ts = max(1, min(int(seq_block), S))
    else:
        ts = _choose_seq_tile(S, B, D, x.dtype.itemsize, pe.dtype.itemsize, block_budget)

    grid = (pl.cdiv(S, ts),)

    return pl.pallas_call(
        _pe_add_kernel,
        out_shape=jax.ShapeDtypeStruct((S, B, D), x.dtype),
        grid=grid,
        in_specs=[
            pl.BlockSpec((ts, B, D), lambda s: (s, 0, 0)),
            pl.BlockSpec((ts, 1, D), lambda s: (s, 0, 0)),
        ],
        out_specs=pl.BlockSpec((ts, B, D), lambda s: (s, 0, 0)),
        compiler_params=pltpu.CompilerParams(
            dimension_semantics=("parallel",),
            vmem_limit_bytes=vmem_limit,
        ),
    )(x, pe)


if __name__ == "__main__":
    fwd = jax.jit(positional_encoding_forward)
    # Force a multi-block grid with a partial tail block (tests the tiled path
    # at small shapes; seq_block is a static keyword, bound before jit).
    fwd_tiled = jax.jit(functools.partial(positional_encoding_forward, seq_block=64))

    max_len = 1000

    # Test 1: small smoke shapes matching the module's (seq, batch, d_model) input.
    S, B, D = 8, 2, 32
    x = jax.random.normal(jax.random.PRNGKey(0), (S, B, D), dtype=jnp.float32)
    pe = build_pe(D, max_len)
    out = jax.block_until_ready(fwd(x, pe))
    ref = x + pe[:S]
    assert out.shape == (S, B, D) and out.dtype == x.dtype
    assert jnp.allclose(out, ref, atol=1e-6, rtol=1e-6)

    # Test 2: lane-dense D=128, multi-block grid (4 blocks) with partial last block.
    S2, B2, D2 = 200, 2, 128
    x2 = jax.random.normal(jax.random.PRNGKey(1), (S2, B2, D2), dtype=jnp.float32)
    pe2 = build_pe(D2, max_len)
    out2 = jax.block_until_ready(fwd_tiled(x2, pe2))
    ref2 = x2 + pe2[:S2]
    assert out2.shape == (S2, B2, D2)
    assert jnp.allclose(out2, ref2, atol=1e-6, rtol=1e-6)

    # Test 3: bf16 I/O (half the HBM bytes on this bandwidth-bound op).
    x3 = x2.astype(jnp.bfloat16)
    pe3 = pe2.astype(jnp.bfloat16)  # pre-cast once, as a module would at init
    out3 = jax.block_until_ready(fwd(x3, pe3))
    ref3 = x3 + pe3[:S2]
    assert out3.dtype == jnp.bfloat16
    assert jnp.allclose(out3.astype(jnp.float32), ref3.astype(jnp.float32),
                        atol=2e-2, rtol=2e-2)

    print("KERNEL_OK")
</pallas_src>

<mosaic_0001>
module attributes {stable_mosaic.version = 11 : i64} {
  func.func @_pe_add_kernel(%arg0: i32, %arg1: memref<8x2x32xf32, #tpu.memory_space<vmem>>, %arg2: memref<8x1x32xf32, #tpu.memory_space<vmem>>, %arg3: memref<8x2x32xf32, #tpu.memory_space<vmem>>) attributes {dimension_semantics = [#tpu.dimension_semantics<parallel>], iteration_bounds = array<i64: 1>, scalar_prefetch = 0 : i64, scratch_operands = 0 : i64, tpu.core_type = #tpu.core_type<tc>, window_params = [{transform_indices = @transform_0, window_bounds = array<i64: 8, 2, 32>}, {transform_indices = @transform_1, window_bounds = array<i64: 8, 1, 32>}, {transform_indices = @transform_2, window_bounds = array<i64: 8, 2, 32>}]} {
    %c0 = arith.constant 0 : index
    %c0_0 = arith.constant 0 : index
    %c0_1 = arith.constant 0 : index
    %0 = vector.load %arg1[%c0, %c0_0, %c0_1] : memref<8x2x32xf32, #tpu.memory_space<vmem>>, vector<8x2x32xf32>
    %c0_2 = arith.constant 0 : index
    %c0_3 = arith.constant 0 : index
    %c0_4 = arith.constant 0 : index
    %1 = vector.load %arg2[%c0_2, %c0_3, %c0_4] : memref<8x1x32xf32, #tpu.memory_space<vmem>>, vector<8x1x32xf32>
    %2 = vector.broadcast %1 : vector<8x1x32xf32> to vector<8x2x32xf32>
    %3 = arith.addf %0, %2 : vector<8x2x32xf32>
    %c0_5 = arith.constant 0 : index
    %c0_6 = arith.constant 0 : index
    %c0_7 = arith.constant 0 : index
    %4 = vector.load %arg3[%c0_5, %c0_6, %c0_7] : memref<8x2x32xf32, #tpu.memory_space<vmem>>, vector<8x2x32xf32>
    tpu.vector_store %arg3[%c0_5, %c0_6, %c0_7], %3 {strides = array<i32>} : memref<8x2x32xf32, #tpu.memory_space<vmem>>, vector<8x2x32xf32>,
    return
  }
  func.func @transform_0(%arg0: i32) -> (i32, i32, i32) {
    %c0_i32 = arith.constant 0 : i32
    %c0_i32_0 = arith.constant 0 : i32
    %c0_i32_1 = arith.constant 0 : i32
    return %arg0, %c0_i32, %c0_i32_0 : i32, i32, i32
  }
  func.func @transform_1(%arg0: i32) -> (i32, i32, i32) {
    %c0_i32 = arith.constant 0 : i32
    %c0_i32_0 = arith.constant 0 : i32
    %c0_i32_1 = arith.constant 0 : i32
    return %arg0, %c0_i32, %c0_i32_0 : i32, i32, i32
  }
  func.func @transform_2(%arg0: i32) -> (i32, i32, i32) {
    %c0_i32 = arith.constant 0 : i32
    %c0_i32_0 = arith.constant 0 : i32
    %c0_i32_1 = arith.constant 0 : i32
    return %arg0, %c0_i32, %c0_i32_0 : i32, i32, i32
  }
}

</mosaic_0001>

<bundles_post_ra>
// kernel: positional_encoding_forward.1
= control target key start
LH: loop header
LB: loop body
LE: loop exit
PB: predicated region body
PF: predicated region fallthrough
CT: control target
= control target key end

     0   :  { %vm60_vm0 = vcmask 254976   ;;  %s201_s0 = inlined_call_operand.vmem [shape: f32[8,2,32], index: 0, kind: input, shape index: {}]   ;;  %s202_s1 = inlined_call_operand.vmem [shape: f32[1000,1,32], index: 1, kind: input, shape index: {}]   ;;  %s203_s2 = inlined_call_operand.hbm [shape: f32[8,2,32], index: 2, kind: output, shape index: {}]  }
   0x1   :  { %v12_v0 = vld [vmem:[%s201_s0] sm:$0x3]  ;;  %v13_v2 = vld [vmem:[%s201_s0 + $0x2] sm:$0x3]  ;;  %v14_v5 = vld [vmem:[%s201_s0 + $0x4] sm:$0x3] }
   0x2   :  { %v90_v1 = vld [vmem:[%s202_s1] ss:$0 sm:$0xff]  ;;  %v91_v4 = vld [vmem:[%s202_s1 + $0x1] ss:$0 sm:$0xff]  ;;  %v92_v6 = vld [vmem:[%s202_s1 + $0x2] ss:$0 sm:$0xff] }
   0x3   :  { %v52_v3 = vadd.f32 %v90_v1, %v12_v0  ;;  %v15_v7 = vld [vmem:[%s201_s0 + $0x6] sm:$0x3]  ;;  %v53_v8 = vadd.f32 %v91_v4, %v13_v2  ;;  %v93_v9 = vld [vmem:[%s202_s1 + $0x3] ss:$0 sm:$0xff]  ;;  %v16_v10 = vld [vmem:[%s201_s0 + $0x8] sm:$0x3]  ;;  %v54_v11 = vadd.f32 %v92_v6, %v14_v5 }
   0x4   :  { %v94_v12 = vld [vmem:[%s202_s1 + $0x4] ss:$0 sm:$0xff]  ;;  %v17_v13 = vld [vmem:[%s201_s0 + $0xa] sm:$0x3]  ;;  %v55_v14 = vadd.f32 %v93_v9, %v15_v7  ;;  %v95_v15 = vld [vmem:[%s202_s1 + $0x5] ss:$0 sm:$0xff] }
   0x5   :  { %61 = vst.msk [vmem:[#allocation2] sm:$0x3] %vm60_vm0, %v52_v3  ;;  %v56_v16 = vadd.f32 %v94_v12, %v16_v10  ;;  %v18_v17 = vld [vmem:[%s201_s0 + $0xc] sm:$0x3]  ;;  %v57_v18 = vadd.f32 %v95_v15, %v17_v13  ;;  %v96_v19 = vld [vmem:[%s202_s1 + $0x6] ss:$0 sm:$0xff] }
   0x6   :  { %62 = vst.msk [vmem:[#allocation2 + $0x2] sm:$0x3] %vm60_vm0, %v53_v8  ;;  %v19_v20 = vld [vmem:[%s201_s0 + $0xe] sm:$0x3]  ;;  %v97_v21 = vld [vmem:[%s202_s1 + $0x7] ss:$0 sm:$0xff]  ;;  %v58_v22 = vadd.f32 %v96_v19, %v18_v17 }
   0x7   :  { %63 = vst.msk [vmem:[#allocation2 + $0x4] sm:$0x3] %vm60_vm0, %v54_v11 }
   0x8   :  { %64 = vst.msk [vmem:[#allocation2 + $0x6] sm:$0x3] %vm60_vm0, %v55_v14 }
   0x9   :  { %65 = vst.msk [vmem:[#allocation2 + $0x8] sm:$0x3] %vm60_vm0, %v56_v16 }
   0xa   :  { %66 = vst.msk [vmem:[#allocation2 + $0xa] sm:$0x3] %vm60_vm0, %v57_v18 }
   0xb   :  { %7 = vsyncpa [#allocation3], 0  ;;  %s124_s13 = smov [#allocation2]   ;;  %s75_s17 = sshll.u32 %s203_s2, 4  ;;  %v59_v23 = vadd.f32 %v97_v21, %v19_v20  ;;  %67 = vst.msk [vmem:[#allocation2 + $0xc] sm:$0x3] %vm60_vm0, %v58_v22  ;;  %s76_s17 = int_to_ptr.hbm [resolvable:$true] %s75_s17 }
   0xc   :  { %s73_s14 = sshll.u32 %s124_s13, 4  ;;  %s125_s0 = smov 32   ;;  %s74_s14 = int_to_ptr.vmem [resolvable:$true] %s73_s14 }
   0xd   :  { %68 = vst.msk [vmem:[#allocation2 + $0xe] sm:$0x3] %vm60_vm0, %v59_v23  ;;  %s126_s18 = smov 2  }
   0xe   :  { %81 = dma.vmem_to_hbm [thread:$0]  %s74_s14, 256, %s76_s17, [#allocation3], %s125_s0, %s125_s0, %s126_s18  }
   0xf   :  { %122 = dma.done.wait [#allocation3], 256  }
  0x10   :  { %123 = vsyncadd [#allocation3], 4294967040 }
  0x11   :  { %86 = vsyncpa [#allocation3], 1 }

</bundles_post_ra>
